<compile_context>
chip_gen: v6e
topology: v6e:2x2x1
jax: 0.10.0
libtpu: 0.0.40
codegen_flags: <defaults>
</compile_context>

<pallas_src>
import functools

import jax
import jax.numpy as jnp
from jax.experimental import pallas as pl
from jax.experimental.pallas import tpu as pltpu


def actor_kernel(x_ref, w1_ref, p_ref, o_ref, *, use_bf16):
    # x_ref: (tb, D) streamed block (f32 from HBM; cast here for the MXU).
    x = x_ref[...]
    if use_bf16:
        x = x.astype(jnp.bfloat16)
    # Hidden layer on the MXU: (tb, D) @ (D, H) with f32 accumulation.
    h = jnp.dot(x, w1_ref[...], preferred_element_type=jnp.float32)
    # Bias + ReLU on the VPU (f32).  p_ref rows: 0 = b1, 1 = w2^T, 2 = b2.
    h = jnp.maximum(h + p_ref[0:1, :], 0.0)                      # (tb, H)
    tb, H = h.shape
    # Output layer (H -> 1) as VPU multiply + lane reduce, producing the
    # result directly in a lane-dense (tb//128, 128) layout (dense stores).
    h3 = h.reshape(tb // 128, 128, H)                            # major-dim split
    w2 = p_ref[1:2, :].reshape(1, 1, H)
    out = jnp.sum(h3 * w2, axis=-1) + p_ref[2:3, 0:1]            # (tb//128, 128)
    o_ref[...] = out.astype(o_ref.dtype)


def _round_up(x, m):
    return ((x + m - 1) // m) * m


def _choose_tb(batch, block_b):
    """Batch-tile rows: multiple of 128 (lane-dense output); multiple of 1024
    in the multi-step path (so the out block's sublane dim is a multiple of
    8); aims for >= 4 grid steps at large B (v7x megacore wants >= 2)."""
    if batch <= 1024:
        return _round_up(batch, 128)          # one block covers everything
    bb = max(1024, (block_b // 1024) * 1024)
    return min(bb, _round_up(pl.cdiv(batch, 4), 1024))


@functools.partial(jax.jit, static_argnames=("block_b", "use_bf16"))
def actor_forward(x, w1, b1, w2, b2, *, block_b=8192, use_bf16=True):
    """Forward pass of Actor([126, 32, 1]).

    x: [B, D_in] float32 (streamed as-is; cast to bf16 in-kernel if use_bf16).
    w1: [D_in, H], b1: [H] or [1, H], w2: [H, 1], b2: [1] or [1, 1]
    (weights stored transposed w.r.t. torch.nn.Linear).
    Returns [B] float32, i.e. torch.squeeze(..., dim=-1).

    use_bf16=True runs the MXU operands in bf16 with f32 accumulation
    (~1e-3-level deviation from the pure-f32 PyTorch module); pass
    use_bf16=False for a full-f32 MXU path.
    """
    B, d_in = x.shape
    H = w1.shape[1]

    tb = _choose_tb(B, block_b)
    grid = (pl.cdiv(B, tb),)
    out_rows = grid[0] * (tb // 128)          # output padded to whole blocks

    # Tiny one-time parameter prep (no pass over x).
    w1_k = w1.astype(jnp.bfloat16 if use_bf16 else jnp.float32)
    p = jnp.concatenate(
        [
            b1.reshape(1, H).astype(jnp.float32),                 # row 0: b1
            w2.reshape(1, H).astype(jnp.float32),                 # row 1: w2^T
            jnp.full((1, H), b2.reshape(-1)[0], jnp.float32),     # row 2: b2
        ],
        axis=0,
    )

    # VMEM: two double-buffered x tiles + in-kernel temporaries. The default
    # block_b stays under the 32 MiB default scoped limit on all generations
    # (v7x: 64 MiB physical); only raise the limit when a bigger tile needs it.
    x_tile_bytes = tb * d_in * x.dtype.itemsize
    vmem_limit = min(max(3 * x_tile_bytes + (4 << 20), 32 << 20), 100 << 20)

    out = pl.pallas_call(
        functools.partial(actor_kernel, use_bf16=use_bf16),
        out_shape=jax.ShapeDtypeStruct((out_rows, 128), jnp.float32),
        grid=grid,
        in_specs=[
            pl.BlockSpec((tb, d_in), lambda i: (i, 0)),   # x: streamed (ragged last block OK)
            pl.BlockSpec((d_in, H), lambda i: (0, 0)),    # w1: VMEM-resident
            pl.BlockSpec((3, H), lambda i: (0, 0)),       # b1 / w2 / b2: resident
        ],
        out_specs=pl.BlockSpec((tb // 128, 128), lambda i: (i, 0)),
        compiler_params=pltpu.CompilerParams(
            dimension_semantics=("parallel",),            # shard batch across TCs (v7x)
            vmem_limit_bytes=vmem_limit,
        ),
    )(x, w1_k, p)

    # Flatten the lane-dense output, drop block padding == torch.squeeze(-1).
    return out.reshape(-1)[:B]


def init_actor_params(key, dim_list=(126, 32, 1)):
    """Deterministic init mimicking PyTorch nn.Linear defaults
    (uniform(-1/sqrt(fan_in), 1/sqrt(fan_in))). Stored transposed vs torch."""
    params = []
    for i in range(len(dim_list) - 1):
        fan_in, fan_out = dim_list[i], dim_list[i + 1]
        key, kw, kb = jax.random.split(key, 3)
        bound = 1.0 / jnp.sqrt(jnp.float32(fan_in))
        w = jax.random.uniform(kw, (fan_in, fan_out), jnp.float32, -bound, bound)
        b = jax.random.uniform(kb, (1, fan_out), jnp.float32, -bound, bound)
        params.append((w, b))
    return params


def reference_forward(x, params, use_bf16=True):
    """Pure-JAX reference. use_bf16=True mirrors the kernel's bf16 MXU
    operands (f32 accumulation); use_bf16=False is the pure-f32 Actor math."""
    (w1, b1), (w2, b2) = params
    if use_bf16:
        h = jnp.dot(x.astype(jnp.bfloat16), w1.astype(jnp.bfloat16),
                    preferred_element_type=jnp.float32)
    else:
        h = jnp.dot(x, w1, preferred_element_type=jnp.float32,
                    precision=jax.lax.Precision.HIGHEST)
    h = jnp.maximum(h + b1.reshape(1, -1), 0.0)
    return jnp.sum(h * w2.reshape(1, -1), axis=-1) + b2.reshape(-1)[0]


if __name__ == "__main__":
    key = jax.random.PRNGKey(0)
    dim_list = (126, 32, 1)
    kp, kx1, kx2, kx3 = jax.random.split(key, 4)
    params = init_actor_params(kp, dim_list)
    (w1, b1), (w2, b2) = params

    # 1) Tiny batch: single ragged block (B < 128 rows of the 128-row tile).
    x1 = jax.random.normal(kx1, (8, dim_list[0]), jnp.float32)
    o1 = jax.block_until_ready(actor_forward(x1, w1, b1, w2, b2))
    r1 = reference_forward(x1, params, use_bf16=True)
    assert o1.shape == (8,), o1.shape
    assert jnp.allclose(o1, r1, atol=1e-3, rtol=1e-3), "mismatch (B=8, bf16)"
    # Sanity vs. the pure-f32 math of the PyTorch module (bf16 MXU rounding).
    rf = reference_forward(x1, params, use_bf16=False)
    assert jnp.allclose(o1, rf, atol=5e-2), "bf16 path too far from f32 reference"

    # 2) Ragged batch that is not a multiple of 128 (still a single block).
    x2 = jax.random.normal(kx2, (300, dim_list[0]), jnp.float32)
    o2 = jax.block_until_ready(actor_forward(x2, w1, b1, w2, b2))
    r2 = reference_forward(x2, params, use_bf16=True)
    assert o2.shape == (300,), o2.shape
    assert jnp.allclose(o2, r2, atol=1e-3, rtol=1e-3), "mismatch (B=300, bf16)"

    # 3) Multi-block ragged batch (grid > 1, lane-dense out blocks).
    x3 = jax.random.normal(kx3, (2500, dim_list[0]), jnp.float32)
    o3 = jax.block_until_ready(actor_forward(x3, w1, b1, w2, b2))
    r3 = reference_forward(x3, params, use_bf16=True)
    assert o3.shape == (2500,), o3.shape
    assert jnp.allclose(o3, r3, atol=1e-3, rtol=1e-3), "mismatch (B=2500, bf16)"

    # 4) Same multi-block case on the full-f32 MXU path.
    o3f = jax.block_until_ready(actor_forward(x3, w1, b1, w2, b2, use_bf16=False))
    r3f = reference_forward(x3, params, use_bf16=False)
    assert jnp.allclose(o3f, r3f, atol=5e-3, rtol=5e-3), "mismatch (B=2500, f32)"

    print("KERNEL_OK")
</pallas_src>

<mosaic_0001>
module attributes {stable_mosaic.version = 11 : i64} {
  func.func @actor_kernel(%arg0: i32, %arg1: memref<128x126xf32, #tpu.memory_space<vmem>>, %arg2: memref<126x32xbf16, #tpu.memory_space<vmem>>, %arg3: memref<3x32xf32, #tpu.memory_space<vmem>>, %arg4: memref<1x128xf32, #tpu.memory_space<vmem>>) attributes {dimension_semantics = [#tpu.dimension_semantics<parallel>], iteration_bounds = array<i64: 1>, scalar_prefetch = 0 : i64, scratch_operands = 0 : i64, tpu.core_type = #tpu.core_type<tc>, window_params = [{transform_indices = @transform_0, window_bounds = array<i64: 128, 126>}, {pipeline_mode = #tpu.pipeline_mode<synchronous>, transform_indices = @transform_1, window_bounds = array<i64: 126, 32>}, {pipeline_mode = #tpu.pipeline_mode<synchronous>, transform_indices = @transform_2, window_bounds = array<i64: 3, 32>}, {transform_indices = @transform_3, window_bounds = array<i64: 1, 128>}]} {
    %c0 = arith.constant 0 : index
    %c0_0 = arith.constant 0 : index
    %0 = vector.load %arg1[%c0, %c0_0] : memref<128x126xf32, #tpu.memory_space<vmem>>, vector<128x126xf32>
    %1 = arith.truncf %0 : vector<128x126xf32> to vector<128x126xbf16>
    %c0_1 = arith.constant 0 : index
    %c0_2 = arith.constant 0 : index
    %2 = vector.load %arg2[%c0_1, %c0_2] : memref<126x32xbf16, #tpu.memory_space<vmem>>, vector<126x32xbf16>
    %cst = arith.constant dense<0.000000e+00> : vector<128x32xf32>
    %3 = tpu.matmul %1, %2, %cst {dimension_numbers = #tpu.dot_dimension_numbers<[1], [0], [0], [1], [0, 0, 1, 1], [], []>} : vector<128x126xbf16>, vector<126x32xbf16>, vector<128x32xf32> -> vector<128x32xf32>
    %c0_3 = arith.constant 0 : index
    %c0_4 = arith.constant 0 : index
    %4 = vector.load %arg3[%c0_3, %c0_4] : memref<3x32xf32, #tpu.memory_space<vmem>>, vector<1x32xf32>
    %5 = vector.broadcast %4 : vector<1x32xf32> to vector<128x32xf32>
    %6 = arith.addf %3, %5 : vector<128x32xf32>
    %cst_5 = arith.constant 0.000000e+00 : f32
    %7 = vector.broadcast %cst_5 : f32 to vector<128x32xf32>
    %8 = arith.maximumf %6, %7 : vector<128x32xf32>
    %9 = vector.shape_cast %8 : vector<128x32xf32> to vector<1x128x32xf32>
    %c1 = arith.constant 1 : index
    %c0_6 = arith.constant 0 : index
    %10 = vector.load %arg3[%c1, %c0_6] : memref<3x32xf32, #tpu.memory_space<vmem>>, vector<1x32xf32>
    %11 = vector.shape_cast %10 : vector<1x32xf32> to vector<1x1x32xf32>
    %12 = vector.broadcast %11 : vector<1x1x32xf32> to vector<1x128x32xf32>
    %13 = arith.mulf %9, %12 : vector<1x128x32xf32>
    %cst_7 = arith.constant dense<0.000000e+00> : vector<1x128xf32>
    %14 = vector.multi_reduction <add>, %13, %cst_7 [2] : vector<1x128x32xf32> to vector<1x128xf32>
    %c2 = arith.constant 2 : index
    %c0_8 = arith.constant 0 : index
    %15 = vector.load %arg3[%c2, %c0_8] : memref<3x32xf32, #tpu.memory_space<vmem>>, vector<1x1xf32>
    %16 = vector.broadcast %15 : vector<1x1xf32> to vector<1x128xf32>
    %17 = arith.addf %14, %16 : vector<1x128xf32>
    %c0_9 = arith.constant 0 : index
    %c0_10 = arith.constant 0 : index
    %18 = vector.load %arg4[%c0_9, %c0_10] : memref<1x128xf32, #tpu.memory_space<vmem>>, vector<1x128xf32>
    tpu.vector_store %arg4[%c0_9, %c0_10], %17 {strides = array<i32>} : memref<1x128xf32, #tpu.memory_space<vmem>>, vector<1x128xf32>,
    return
  }
  func.func @transform_0(%arg0: i32) -> (i32, i32) {
    %c0_i32 = arith.constant 0 : i32
    %c0_i32_0 = arith.constant 0 : i32
    return %arg0, %c0_i32 : i32, i32
  }
  func.func @transform_1(%arg0: i32) -> (i32, i32) {
    %c0_i32 = arith.constant 0 : i32
    %c0_i32_0 = arith.constant 0 : i32
    %c0_i32_1 = arith.constant 0 : i32
    return %c0_i32, %c0_i32_0 : i32, i32
  }
  func.func @transform_2(%arg0: i32) -> (i32, i32) {
    %c0_i32 = arith.constant 0 : i32
    %c0_i32_0 = arith.constant 0 : i32
    %c0_i32_1 = arith.constant 0 : i32
    return %c0_i32, %c0_i32_0 : i32, i32
  }
  func.func @transform_3(%arg0: i32) -> (i32, i32) {
    %c0_i32 = arith.constant 0 : i32
    %c0_i32_0 = arith.constant 0 : i32
    return %arg0, %c0_i32 : i32, i32
  }
}

</mosaic_0001>

<bundles_post_ra>
// kernel: actor_forward.1
= control target key start
LH: loop header
LB: loop body
LE: loop exit
PB: predicated region body
PF: predicated region fallthrough
CT: control target
= control target key end

     0   :  { %vm132_vm0 = vcmask 1046528   ;;  %vm107_vm1 = vcmask 1031168   ;;  %v621_v33 = vmov 0   ;;  %vm270_vm2 = vcmask 261120   ;;  %s823_s1 = inlined_call_operand.vmem [shape: bf16[126,32], index: 1, kind: input, shape index: {}]   ;;  %s824_s0 = inlined_call_operand.vmem [shape: f32[8,126], index: 0, kind: input, shape index: {}]   ;;  %s825_s2 = inlined_call_operand.vmem [shape: f32[3,32], index: 2, kind: input, shape index: {}]   ;;  %s826_s3 = inlined_call_operand.vmem [shape: f32[1,128], index: 3, kind: output, shape index: {}]  }
   0x1   :  { %v613_v0 = vld [vmem:[%s823_s1 + $0x38] sm:$0x7f]   ;;  %v614_v1 = vld [vmem:[%s823_s1 + $0x30] sm:$0xff]   ;;  %v615_v3 = vld [vmem:[%s823_s1 + $0x28] sm:$0xff]   ;;  %611 = vset.pattern.permute.xlu1 %v621_v33  ;;  %612 = vset.pattern.permute.xlu0 %v621_v33  ;;  %vm420_vm3 = vcmask 130112   ;;  %vm427_vm4 = vcmask 195712  }
   0x2   :  { %608 = vmatprep.subr.msk.bf16.mxu0 %vm132_vm0, %v613_v0  ;;  %v134_v2 = vsel %vm132_vm0, %v613_v0, 0  ;;  %609 = vmatprep.subr.msk.bf16.mxu1 %vm132_vm0, %v613_v0  ;;  %v616_v4 = vld [vmem:[%s823_s1 + $0x20] sm:$0xff]   ;;  %v16_v6 = vld [vmem:[%s824_s0 + $0x8] sm:$0xff]  ;;  %v617_v10 = vld [vmem:[%s823_s1 + $0x18] sm:$0xff]   ;;  %vm434_vm5 = vcmask 261312   ;;  %vm441_vm6 = vcmask 326912  }
   0x3   :  { %561 = vmatpush3.bf16.msra.mxu0 %v134_v2  ;;  %600 = vmatpush3.bf16.msra.mxu1 %v134_v2  ;;  %v15_v5 = vld [vmem:[%s824_s0] sm:$0xff]  ;;  %v24_v9 = vld [vmem:[%s824_s0 + $0x48] sm:$0xff]  ;;  %v618_v12 = vld [vmem:[%s823_s1 + $0x10] sm:$0xff]   ;;  %vm448_vm7 = vcmask 392512   ;;  %vm455_vm8 = vcmask 458112   ;;  %vm462_vm9 = vcmask 523712  }
   0x4   :  { %562 = vmatprep.subr.bf16.mxu0 %v614_v1  ;;  %593 = vmatprep.subr.bf16.mxu1 %v614_v1  ;;  %v31_v7 = vpack.c.bf16 %v16_v6, %v15_v5  ;;  %v23_v8 = vld [vmem:[%s824_s0 + $0x40] sm:$0xff]  ;;  %v619_v13 = vld [vmem:[%s823_s1 + $0x8] sm:$0xff]   ;;  %v17_v15 = vld [vmem:[%s824_s0 + $0x10] sm:$0xff]  ;;  %vm469_vm10 = vcmask 589312   ;;  %vm476_vm11 = vcmask 654912   ;;  %vm483_vm12 = vcmask 720512  }
   0x5   :  { %v35_v11 = vpack.c.bf16 %v24_v9, %v23_v8  ;;  %v620_v14 = vld [vmem:[%s823_s1] sm:$0xff]   ;;  %v18_v16 = vld [vmem:[%s824_s0 + $0x18] sm:$0xff]  ;;  %v25_v18 = vld [vmem:[%s824_s0 + $0x50] sm:$0xff]  ;;  %vm490_vm13 = vcmask 786112   ;;  %vm497_vm14 = vcmask 851712   ;;  %vm504_vm15 = vcmask 917312  }
   0x6   :  { %576 = vmatprep.mubr.msk.bf16.mxu0 %vm107_vm1, %v31_v7  ;;  %v19_v17 = vld [vmem:[%s824_s0 + $0x20] sm:$0xff]  ;;  %v26_v19 = vld [vmem:[%s824_s0 + $0x58] sm:$0xff]  ;;  %v20_v20 = vld [vmem:[%s824_s0 + $0x28] sm:$0xff]  ;;  %v32_v23 = vpack.c.bf16 %v18_v16, %v17_v15  ;;  %vm511_vm0 = vcmask 982912  }
   0x7   :  { %563 = vmatpush3.bf16.msra.mxu0 %v614_v1  ;;  %601 = vmatpush3.bf16.msra.mxu1 %v614_v1  ;;  %v27_v21 = vld [vmem:[%s824_s0 + $0x60] sm:$0xff]  ;;  %v28_v22 = vld [vmem:[%s824_s0 + $0x68] sm:$0xff]  ;;  %v36_v24 = vpack.c.bf16 %v26_v19, %v25_v18  ;;  %v33_v25 = vpack.c.bf16 %v20_v20, %v19_v17  ;;  %v21_v27 = vld [vmem:[%s824_s0 + $0x30] sm:$0xff] }
   0x8   :  { %564 = vmatprep.subr.bf16.mxu0 %v615_v3  ;;  %594 = vmatprep.subr.bf16.mxu1 %v615_v3  ;;  %v37_v26 = vpack.c.bf16 %v28_v22, %v27_v21  ;;  %v22_v28 = vld [vmem:[%s824_s0 + $0x38] sm:$0xff]  ;;  %v29_v29 = vld [vmem:[%s824_s0 + $0x70] sm:$0xff]  ;;  %v725_v34 = vld [vmem:[%s825_s2] ss:$0 sm:$0xff] }
   0x9   :  { %584 = vmatprep.mubr.msk.bf16.mxu1 %vm107_vm1, %v35_v11  ;;  %v30_v30 = vld [vmem:[%s824_s0 + $0x78] sm:$0xff]  ;;  %v34_v31 = vpack.c.bf16 %v22_v28, %v21_v27  ;;  %v731_v39 = vld [vmem:[%s825_s2 + $0x1] ss:$0 sm:$0xff] }
   0xa   :  { %v38_v32 = vpack.c.bf16 %v30_v30, %v29_v29 }
   0xb   :  { %565 = vmatpush3.bf16.msra.mxu0 %v615_v3  ;;  %602 = vmatpush3.bf16.msra.mxu1 %v615_v3 }
   0xc   :  { %566 = vmatprep.subr.bf16.mxu0 %v616_v4  ;;  %595 = vmatprep.subr.bf16.mxu1 %v616_v4 }
   0xf   :  { %567 = vmatpush3.bf16.msra.mxu0 %v616_v4  ;;  %603 = vmatpush3.bf16.msra.mxu1 %v616_v4 }
  0x10   :  { %568 = vmatprep.subr.bf16.mxu0 %v617_v10  ;;  %596 = vmatprep.subr.bf16.mxu1 %v617_v10 }
  0x13   :  { %569 = vmatpush3.bf16.msra.mxu0 %v617_v10  ;;  %604 = vmatpush3.bf16.msra.mxu1 %v617_v10 }
  0x14   :  { %570 = vmatprep.subr.bf16.mxu0 %v618_v12  ;;  %597 = vmatprep.subr.bf16.mxu1 %v618_v12 }
  0x17   :  { %571 = vmatpush3.bf16.msra.mxu0 %v618_v12  ;;  %605 = vmatpush3.bf16.msra.mxu1 %v618_v12 }
  0x18   :  { %572 = vmatprep.subr.bf16.mxu0 %v619_v13  ;;  %598 = vmatprep.subr.bf16.mxu1 %v619_v13 }
  0x1b   :  { %573 = vmatpush3.bf16.msra.mxu0 %v619_v13  ;;  %606 = vmatpush3.bf16.msra.mxu1 %v619_v13 }
  0x1c   :  { %574 = vmatprep.subr.bf16.mxu0 %v620_v14  ;;  %599 = vmatprep.subr.bf16.mxu1 %v620_v14 }
  0x1f   :  { %575 = vmatpush3.bf16.msra.mxu0 %v620_v14  ;;  %607 = vmatpush3.bf16.msra.mxu1 %v620_v14 }
  0x22   :  { %577 = vmatmul.mubr.msk.bf16.vlgmr.msra.gmra.mxu0 %vm107_vm1, %v32_v23  ;;  %585 = vmatmul.mubr.msk.bf16.vlgmr.msra.gmra.mxu1 %vm107_vm1, %v36_v24 }
  0x23   :  { %580 = vmatprep.mubr.msk.bf16.mxu0 %vm107_vm1, %v33_v25  ;;  %588 = vmatprep.mubr.msk.bf16.mxu1 %vm107_vm1, %v37_v26 }
  0x2a   :  { %581 = vmatmul.mubr.msk.bf16.gmra.mxu0 %vm107_vm1, %v34_v31  ;;  %589 = vmatmul.mubr.msk.bf16.gmra.mxu1 %vm107_vm1, %v38_v32  ;;  %vm518_vm1 = vcmask 1048512  }
  0xe2   :  { %v578_v35 = vpop.f32.mrf.mxu0  ;;  %v586_v36 = vpop.f32.mrf.mxu1 }
  0xe3   :  { %v179_v37 = vadd.f32 %v578_v35, %v725_v34  ;;  %v211_v23 = vadd.f32 %v586_v36, %v725_v34 }
  0xe4   :  { %v170_v38 = vpop.f32.mrf.mxu0  ;;  %v202_v40 = vpop.f32.mrf.mxu1 }
  0xe5   :  { %v235_v41 = vmax.f32 %v179_v37, 0.0  ;;  %v171_v42 = vadd.f32 %v725_v34, %v170_v38  ;;  %v203_v10 = vadd.f32 %v725_v34, %v202_v40  ;;  %v243_v28 = vmax.f32 %v211_v23, 0.0 }
  0xe6   :  { %v579_v43 = vpop.f32.mrf.mxu0  ;;  %v587_v47 = vpop.f32.mrf.mxu1 }
  0xe7   :  { %v233_v44 = vmax.f32 %v171_v42, 0.0  ;;  %v182_v45 = vadd.f32 %v579_v43, %v725_v34  ;;  %v256_v46 = vmul.f32 %v731_v39, %v235_v41  ;;  %v214_v49 = vadd.f32 %v587_v47, %v725_v34 }
  0xe8   :  { %v173_v48 = vpop.f32.mrf.mxu0  ;;  %v205_v11 = vpop.f32.mrf.mxu1  ;;  %v241_v16 = vmax.f32 %v203_v10, 0.0  ;;  %v264_v37 = vmul.f32 %v731_v39, %v243_v28 }
  0xe9   :  { %v236_v50 = vmax.f32 %v182_v45, 0.0  ;;  %v174_v51 = vadd.f32 %v725_v34, %v173_v48  ;;  %v277_v52 = vsel %vm270_vm2, %v256_v46, 0.0  ;;  %v254_v53 = vmul.f32 %v731_v39, %v233_v44  ;;  %v319_v44 = vld [vmem:[%s825_s2 + $0x2] sm:$0x1] }
  0xea   :  { %278 = vadd.xlane.f32.xlu1 %v277_v52  ;;  %v582_v54 = vpop.f32.mrf.mxu0  ;;  %v244_v55 = vmax.f32 %v214_v49, 0.0  ;;  %v206_v18 = vadd.f32 %v725_v34, %v205_v11  ;;  %v590_v19 = vpop.f32.mrf.mxu1  ;;  %v262_v25 = vmul.f32 %v731_v39, %v241_v16  ;;  %v301_v41 = vsel %vm270_vm2, %v264_v37, 0.0 }
  0xeb   :  { %v234_v56 = vmax.f32 %v174_v51, 0.0  ;;  %v195_v57 = vadd.f32 %v582_v54, %v725_v34  ;;  %v271_v58 = vsel %vm270_vm2, %v254_v53, 0.0  ;;  %v257_v59 = vmul.f32 %v731_v39, %v236_v50 }
  0xec   :  { %v186_v60 = vpop.f32.mrf.mxu0  ;;  %272 = vadd.xlane.f32.xlu0 %v271_v58  ;;  %v265_v61 = vmul.f32 %v731_v39, %v244_v55  ;;  %v242_v24 = vmax.f32 %v206_v18, 0.0  ;;  %v218_v26 = vpop.f32.mrf.mxu1  ;;  %v295_v29 = vsel %vm270_vm2, %v262_v25, 0.0  ;;  %v227_v33 = vadd.f32 %v590_v19, %v725_v34 }
  0xed   :  { %v239_v62 = vmax.f32 %v195_v57, 0.0  ;;  %v187_v63 = vadd.f32 %v725_v34, %v186_v60  ;;  %v280_v0 = vsel %vm270_vm2, %v257_v59, 0.0  ;;  %v255_v1 = vmul.f32 %v731_v39, %v234_v56 }
  0xee   :  { %281 = vadd.xlane.f32.xlu1 %v280_v0  ;;  %v583_v2 = vpop.f32.mrf.mxu0  ;;  %v304_v3 = vsel %vm270_vm2, %v265_v61, 0.0  ;;  %v219_v30 = vadd.f32 %v725_v34, %v218_v26  ;;  %v263_v31 = vmul.f32 %v731_v39, %v242_v24  ;;  %v591_v32 = vpop.f32.mrf.mxu1  ;;  %v247_v40 = vmax.f32 %v227_v33, 0.0 }
  0xef   :  { %v237_v4 = vmax.f32 %v187_v63, 0.0  ;;  %v198_v5 = vadd.f32 %v583_v2, %v725_v34  ;;  %v274_v6 = vsel %vm270_vm2, %v255_v1, 0.0  ;;  %v260_v7 = vmul.f32 %v731_v39, %v239_v62 }
  0xf0   :  { %v189_v8 = vpop.f32.mrf.mxu0  ;;  %275 = vadd.xlane.f32.xlu0 %v274_v6  ;;  %v245_v35 = vmax.f32 %v219_v30, 0.0  ;;  %v298_v36 = vsel %vm270_vm2, %v263_v31, 0.0  ;;  %v221_v38 = vpop.f32.mrf.mxu1  ;;  %v230_v45 = vadd.f32 %v591_v32, %v725_v34  ;;  %v268_v48 = vmul.f32 %v731_v39, %v247_v40 }
  0xf1   :  { %v190_v9 = vadd.f32 %v725_v34, %v189_v8  ;;  %v240_v12 = vmax.f32 %v198_v5, 0.0  ;;  %v289_v14 = vsel %vm270_vm2, %v260_v7, 0.0  ;;  %v258_v15 = vmul.f32 %v731_v39, %v237_v4 }
  0xf2   :  { %v222_v42 = vadd.f32 %v725_v34, %v221_v38  ;;  %v266_v43 = vmul.f32 %v731_v39, %v245_v35  ;;  %v248_v49 = vmax.f32 %v230_v45, 0.0  ;;  %v313_v50 = vsel %vm270_vm2, %v268_v48, 0.0 }
  0xf3   :  { %v238_v13 = vmax.f32 %v190_v9, 0.0  ;;  %v283_v21 = vsel %vm270_vm2, %v258_v15, 0.0  ;;  %v261_v22 = vmul.f32 %v731_v39, %v240_v12  ;;  %v324_v57 = vlaneseq }
  0xf4   :  { %290 = vadd.xlane.f32.xlu0 %v289_v14  ;;  %v246_v46 = vmax.f32 %v222_v42, 0.0  ;;  %v307_v47 = vsel %vm270_vm2, %v266_v43, 0.0  ;;  %v269_v53 = vmul.f32 %v731_v39, %v248_v49 }
  0xf5   :  { %v259_v17 = vmul.f32 %v731_v39, %v238_v13  ;;  %v292_v27 = vsel %vm270_vm2, %v261_v22, 0.0  ;;  %v783_v60 = vshrl.u32 %v324_v57, 7 }
  0xf6   :  { %v267_v51 = vmul.f32 %v731_v39, %v246_v46  ;;  %v316_v54 = vsel %vm270_vm2, %v269_v53, 0.0 }
  0xf7   :  { %v286_v20 = vsel %vm270_vm2, %v259_v17, 0.0  ;;  %v326_v63 = vsub.s32 0, %v783_v60 }
  0xf8   :  { %287 = vadd.xlane.f32.xlu1 %v286_v20  ;;  %284 = vadd.xlane.f32.xlu0 %v283_v21  ;;  %v310_v52 = vsel %vm270_vm2, %v267_v51, 0.0 }
  0xfc   :  { %293 = vadd.xlane.f32.xlu0 %v292_v27 }
 0x100   :  { %296 = vadd.xlane.f32.xlu0 %v295_v29  ;;  %v786_v29 = vand.u32 127, %v324_v57 }
 0x102   :  { %v415_v30 = vadd.s32 4294967288, %v786_v29  ;;  %v422_v35 = vadd.s32 4294967280, %v786_v29  ;;  %v413_v37 = vsub.s32 %v786_v29, %v783_v60  ;;  %v436_v40 = vadd.s32 4294967264, %v786_v29 }
 0x103   :  { %v443_v49 = vadd.s32 4294967256, %v786_v29  ;;  %v450_v53 = vadd.s32 4294967248, %v786_v29  ;;  %v457_v57 = vadd.s32 4294967240, %v786_v29 }
 0x104   :  { %299 = vadd.xlane.f32.xlu0 %v298_v36  ;;  %v418_v33 = vsub.s32 %v415_v30, %v783_v60  ;;  %v425_v43 = vsub.s32 %v422_v35, %v783_v60  ;;  %v439_v46 = vsub.s32 %v436_v40, %v783_v60 }
 0x108   :  { %302 = vadd.xlane.f32.xlu0 %v301_v41  ;;  %v429_v41 = vadd.s32 4294967272, %v786_v29 }
 0x109   :  { %322 = vperm.xlu1 %611, %v319_v44  }
 0x10c   :  { %308 = vadd.xlane.f32.xlu0 %v307_v47  ;;  %v432_v47 = vsub.s32 %v429_v41, %v783_v60 }
 0x110   :  { %314 = vadd.xlane.f32.xlu0 %v313_v50 }
 0x114   :  { %311 = vadd.xlane.f32.xlu0 %v310_v52 }
 0x118   :  { %317 = vadd.xlane.f32.xlu0 %v316_v54 }
 0x12d   :  { %305 = vadd.xlane.f32.xlu1 %v304_v3 }
 0x173   :  { %v279_v55 = vpop.xlane.xlu1 %278 }
 0x175   :  { %v273_v34 = vpop.xlane.xlu0 %272 }
 0x177   :  { %v282_v58 = vpop.xlane.xlu1 %281 }
 0x179   :  { %v276_v56 = vpop.xlane.xlu0 %275 }
 0x17d   :  { %v291_v59 = vpop.xlane.xlu0 %290 }
 0x181   :  { %v288_v61 = vpop.xlane.xlu1 %287  ;;  %v285_v62 = vpop.xlane.xlu0 %284 }
 0x185   :  { %v323_v0 = vpop.permute.xlu1 %322  ;;  %v294_v1 = vpop.xlane.xlu0 %293 }
 0x186   :  { %v327_v39 = vrot.slane %v323_v0, %v326_v63  ;;  %v464_v63 = vadd.s32 4294967232, %v786_v29  ;;  %v460_v0 = vsub.s32 %v457_v57, %v783_v60 }
 0x188   :  { %v331_v2 = vadd.f32 %v327_v39, %v279_v55  ;;  %v329_v4 = vadd.f32 %v327_v39, %v273_v34  ;;  %v332_v8 = vadd.f32 %v327_v39, %v282_v58  ;;  %v336_v9 = vadd.f32 %v327_v39, %v294_v1 }
 0x189   :  { %v297_v5 = vpop.xlane.xlu0 %296  ;;  %v330_v10 = vadd.f32 %v327_v39, %v276_v56  ;;  %v334_v11 = vadd.f32 %v327_v39, %v288_v61  ;;  %v335_v12 = vadd.f32 %v327_v39, %v291_v59  ;;  %v333_v14 = vadd.f32 %v327_v39, %v285_v62 }
 0x18a   :  { %368 = vperm.xlu1 %611, %v331_v2   ;;  %362 = vperm.xlu0 %612, %v329_v4   ;;  %v337_v3 = vadd.f32 %v327_v39, %v297_v5  ;;  %v446_v55 = vsub.s32 %v443_v49, %v783_v60  ;;  %v453_v59 = vsub.s32 %v450_v53, %v783_v60  ;;  %v471_v2 = vadd.s32 4294967224, %v786_v29 }
 0x18b   :  { %v467_v4 = vsub.s32 %v464_v63, %v783_v60 }
 0x18d   :  { %v300_v6 = vpop.xlane.xlu0 %299 }
 0x18e   :  { %v338_v7 = vadd.f32 %v327_v39, %v300_v6  ;;  %386 = vperm.xlu1 %611, %v337_v3   ;;  %v478_v6 = vadd.s32 4294967216, %v786_v29 }
 0x190   :  { %389 = vperm.xlu0 %612, %v338_v7   ;;  %v474_v7 = vsub.s32 %v471_v2, %v783_v60 }
 0x191   :  { %v303_v13 = vpop.xlane.xlu0 %302 }
 0x192   :  { %371 = vperm.xlu1 %611, %v332_v8   ;;  %v339_v16 = vadd.f32 %v327_v39, %v303_v13 }
 0x194   :  { %383 = vperm.xlu0 %612, %v336_v9  }
 0x195   :  { %v309_v15 = vpop.xlane.xlu0 %308 }
 0x196   :  { %365 = vperm.xlu1 %611, %v330_v10   ;;  %v341_v17 = vadd.f32 %v327_v39, %v309_v15  ;;  %v485_v10 = vadd.s32 4294967208, %v786_v29 }
 0x198   :  { %377 = vperm.xlu0 %612, %v334_v11  }
 0x199   :  { %v315_v18 = vpop.xlane.xlu0 %314 }
 0x19a   :  { %380 = vperm.xlu1 %611, %v335_v12   ;;  %v343_v19 = vadd.f32 %v327_v39, %v315_v18  ;;  %v481_v12 = vsub.s32 %v478_v6, %v783_v60 }
 0x19d   :  { %v312_v20 = vpop.xlane.xlu0 %311 }
 0x19e   :  { %374 = vperm.xlu1 %611, %v333_v14   ;;  %v342_v23 = vadd.f32 %v327_v39, %v312_v20  ;;  %v492_v14 = vadd.s32 4294967200, %v786_v29 }
 0x1a1   :  { %v318_v24 = vpop.xlane.xlu0 %317 }
 0x1a2   :  { %392 = vperm.xlu1 %611, %v339_v16   ;;  %v344_v25 = vadd.f32 %v327_v39, %v318_v24  ;;  %v488_v16 = vsub.s32 %v485_v10, %v783_v60 }
 0x1a6   :  { %398 = vperm.xlu1 %611, %v341_v17   ;;  %v499_v17 = vadd.s32 4294967192, %v786_v29 }
 0x1aa   :  { %404 = vperm.xlu1 %611, %v343_v19  }
 0x1b6   :  { %v306_v21 = vpop.xlane.xlu1 %305 }
 0x1b7   :  { %v340_v22 = vadd.f32 %v327_v39, %v306_v21  ;;  %v495_v21 = vsub.s32 %v492_v14, %v783_v60 }
 0x1b9   :  { %395 = vperm.xlu0 %612, %v340_v22   ;;  %v506_v22 = vadd.s32 4294967184, %v786_v29 }
 0x1bd   :  { %401 = vperm.xlu0 %612, %v342_v23  }
 0x1c1   :  { %407 = vperm.xlu0 %612, %v344_v25   ;;  %v502_v25 = vsub.s32 %v499_v17, %v783_v60 }
 0x205   :  { %v369_v26 = vpop.permute.xlu1 %368  ;;  %v363_v32 = vpop.permute.xlu0 %362 }
 0x206   :  { %v414_v44 = vrot.slane %v363_v32, %v413_v37  ;;  %v426_v51 = vrot.slane %v369_v26, %v425_v43  ;;  %v513_v26 = vadd.s32 4294967176, %v786_v29 }
 0x209   :  { %v387_v27 = vpop.permute.xlu1 %386 }
 0x20a   :  { %v468_v11 = vrot.slane %v387_v27, %v467_v4 }
 0x20b   :  { %v390_v36 = vpop.permute.xlu0 %389 }
 0x20c   :  { %v475_v15 = vrot.slane %v390_v36, %v474_v7  ;;  %v516_v36 = vsub.s32 %v513_v26, %v783_v60 }
 0x20d   :  { %v372_v28 = vpop.permute.xlu1 %371 }
 0x20e   :  { %v433_v34 = vrot.slane %v372_v28, %v432_v47 }
 0x20f   :  { %v384_v45 = vpop.permute.xlu0 %383 }
 0x210   :  { %v461_v3 = vrot.slane %v384_v45, %v460_v0 }
 0x211   :  { %v366_v31 = vpop.permute.xlu1 %365 }
 0x212   :  { %v419_v42 = vrot.slane %v366_v31, %v418_v33  ;;  %v509_v31 = vsub.s32 %v506_v22, %v783_v60 }
 0x213   :  { %v378_v56 = vpop.permute.xlu0 %377 }
 0x214   :  { %v421_v48 = vsel %vm420_vm3, %v419_v42, %v414_v44  ;;  %v447_v62 = vrot.slane %v378_v56, %v446_v55 }
 0x215   :  { %v381_v38 = vpop.permute.xlu1 %380  ;;  %v428_v52 = vsel %vm427_vm4, %v426_v51, %v421_v48 }
 0x216   :  { %v435_v58 = vsel %vm434_vm5, %v433_v34, %v428_v52  ;;  %v454_v39 = vrot.slane %v381_v38, %v453_v59 }
 0x219   :  { %v375_v50 = vpop.permute.xlu1 %374 }
 0x21a   :  { %v440_v54 = vrot.slane %v375_v50, %v439_v46 }
 0x21c   :  { %v442_v61 = vsel %vm441_vm6, %v440_v54, %v435_v58 }
 0x21d   :  { %v449_v1 = vsel %vm448_vm7, %v447_v62, %v442_v61  ;;  %v393_v8 = vpop.permute.xlu1 %392 }
 0x21e   :  { %v456_v5 = vsel %vm455_vm8, %v454_v39, %v449_v1  ;;  %v482_v20 = vrot.slane %v393_v8, %v481_v12 }
 0x21f   :  { %v463_v9 = vsel %vm462_vm9, %v461_v3, %v456_v5 }
 0x220   :  { %v470_v13 = vsel %vm469_vm10, %v468_v11, %v463_v9 }
 0x221   :  { %v477_v18 = vsel %vm476_vm11, %v475_v15, %v470_v13  ;;  %v399_v19 = vpop.permute.xlu1 %398 }
 0x222   :  { %v484_v27 = vsel %vm483_vm12, %v482_v20, %v477_v18  ;;  %v496_v30 = vrot.slane %v399_v19, %v495_v21 }
 0x225   :  { %v405_v33 = vpop.permute.xlu1 %404 }
 0x226   :  { %v510_v40 = vrot.slane %v405_v33, %v509_v31 }
 0x234   :  { %v396_v23 = vpop.permute.xlu0 %395 }
 0x235   :  { %v489_v24 = vrot.slane %v396_v23, %v488_v16 }
 0x237   :  { %v491_v28 = vsel %vm490_vm13, %v489_v24, %v484_v27 }
 0x238   :  { %v402_v32 = vpop.permute.xlu0 %401  ;;  %v498_v37 = vsel %vm497_vm14, %v496_v30, %v491_v28 }
 0x239   :  { %v503_v35 = vrot.slane %v402_v32, %v502_v25 }
 0x23b   :  { %v505_v38 = vsel %vm504_vm15, %v503_v35, %v498_v37 }
 0x23c   :  { %v408_v41 = vpop.permute.xlu0 %407  ;;  %v512_v29 = vsel %vm511_vm0, %v510_v40, %v505_v38 }
 0x23d   :  { %v517_v42 = vrot.slane %v408_v41, %v516_v36 }
 0x23f   :  { %v519_v43 = vsel %vm518_vm1, %v517_v42, %v512_v29 }
 0x240   :  { %521 = vst [vmem:[%s826_s3] sm:$0x1] %v519_v43 }

</bundles_post_ra>
